<compile_context>
chip_gen: v6e
topology: v6e:2x2x1
jax: 0.10.0
libtpu: 0.0.40
codegen_flags: <defaults>
</compile_context>

<pallas_src>
import functools

import jax
import jax.numpy as jnp
from jax import lax
from jax.experimental import pallas as pl
from jax.experimental.pallas import tpu as pltpu

_LANES = 128
_SUBLANES = 8
_ACC_ROWS = 64                       # 8 f32 vregs -> 8 independent VPU add chains
_DEFAULT_TILE_ROWS = 8192            # 8192 x 128 x 4 B = 4 MiB per f32 input tile
_VMEM_LIMIT_BYTES = 48 << 20         # above v5e's 16 MiB scoped default, below v7x's 64 MiB


def _mae_partial_kernel(ori_ref, cyc_ref, out_ref, *, acc_rows, chunks, unroll):
    """Accumulate sum(|ori - cyc|) of one (tile_rows, 128) block into out_ref."""
    i = pl.program_id(1)  # inner reduction step ("arbitrary" axis)

    @pl.when(i == 0)
    def _():
        out_ref[...] = jnp.zeros_like(out_ref)

    def body(j, acc):
        r = pl.multiple_of(j * acc_rows, acc_rows)
        a = ori_ref[pl.ds(r, acc_rows), :].astype(jnp.float32)
        b = cyc_ref[pl.ds(r, acc_rows), :].astype(jnp.float32)
        return acc + jnp.abs(a - b)

    # Chunked streaming reduction: never materializes the full diff tile; keeps
    # acc_rows/8 independent vreg add chains live for VPU ILP.
    out_ref[...] += lax.fori_loop(
        0, chunks, body,
        jnp.zeros((acc_rows, _LANES), jnp.float32),
        unroll=unroll)


def cycle_consistency(ori, cyc, *, max_tile_rows=_DEFAULT_TILE_ROWS):
    """mean(|ori - cyc|) — Pallas TPU implementation of Cycle_Consistency.forward."""
    assert ori.shape == cyc.shape, "ori and cyc must have the same shape"
    n = ori.size

    ori_f = ori.reshape(-1)
    cyc_f = cyc.reshape(-1)

    # Shapes the streaming kernel cannot cover without an HBM copy (tiny, or not a
    # multiple of 128): a single fused XLA pass is already bandwidth-optimal.
    if n < _SUBLANES * _LANES or n % _LANES != 0:
        return jnp.mean(jnp.abs(ori_f.astype(jnp.float32) - cyc_f.astype(jnp.float32)))

    rows_total = n // _LANES
    ori2 = ori_f.reshape(rows_total, _LANES)   # contiguous reshape: no HBM copy
    cyc2 = cyc_f.reshape(rows_total, _LANES)

    # Block layout: only full blocks go through the kernel (no masking, no padding).
    rows8 = (rows_total // _SUBLANES) * _SUBLANES
    cap = max(int(max_tile_rows), _SUBLANES)
    n_blocks = pl.cdiv(rows8, cap)
    raw = rows8 // n_blocks                                  # balanced rows per block
    acc_rows = _ACC_ROWS if raw >= _ACC_ROWS else _SUBLANES
    tile_rows = (raw // acc_rows) * acc_rows                 # multiple of acc_rows (>= 8)
    kernel_rows = n_blocks * tile_rows                       # rows streamed by the kernel
    chunks = tile_rows // acc_rows

    # Outer "parallel" axis only when it divides evenly (no redundant blocks);
    # harmless on single-TC v5e/v6e, shards across TensorCores where supported.
    n_outer = 2 if (n_blocks >= 2 and n_blocks % 2 == 0) else 1
    inner_steps = n_blocks // n_outer

    kernel = functools.partial(
        _mae_partial_kernel,
        acc_rows=acc_rows,
        chunks=chunks,
        unroll=min(chunks, 8),
    )

    def in_map(o, i):
        return (o * inner_steps + i, 0)

    partials = pl.pallas_call(
        kernel,
        out_shape=jax.ShapeDtypeStruct((n_outer * acc_rows, _LANES), jnp.float32),
        grid_spec=pltpu.PrefetchScalarGridSpec(
            num_scalar_prefetch=0,
            grid=(n_outer, inner_steps),
            in_specs=[
                pl.BlockSpec((tile_rows, _LANES), in_map),
                pl.BlockSpec((tile_rows, _LANES), in_map),
            ],
            out_specs=pl.BlockSpec((acc_rows, _LANES), lambda o, i: (o, 0)),
        ),
        compiler_params=pltpu.CompilerParams(
            dimension_semantics=("parallel", "arbitrary"),
            vmem_limit_bytes=_VMEM_LIMIT_BYTES,
        ),
    )(ori2, cyc2)

    total = jnp.sum(partials)   # tiny final cross-lane reduce outside the kernel

    if kernel_rows < rows_total:
        # Small unaligned remainder (< n_blocks*acc_rows + 8 rows): plain jnp on the
        # suffix only — no copy / re-read of the bulk tensor.
        tail = jnp.abs(ori2[kernel_rows:].astype(jnp.float32)
                       - cyc2[kernel_rows:].astype(jnp.float32))
        total = total + jnp.sum(tail)

    return total / n


if __name__ == "__main__":
    key = jax.random.PRNGKey(0)
    keys = jax.random.split(key, 8)

    def ref_mae(a, b):
        return jnp.mean(jnp.abs(a.astype(jnp.float32) - b.astype(jnp.float32)))

    # 1) Small NCHW tensors, as the PyTorch module would see (single block path).
    ori = jax.random.normal(keys[0], (2, 4, 16, 16), dtype=jnp.float32)
    cyc = jax.random.normal(keys[1], (2, 4, 16, 16), dtype=jnp.float32)
    loss = cycle_consistency(ori, cyc)
    jax.block_until_ready(loss)
    assert jnp.allclose(loss, ref_mae(ori, cyc), rtol=1e-5, atol=1e-6), (loss, ref_mae(ori, cyc))

    # 2) Multi-block inner-reduction path (odd block count -> single outer block).
    o3 = jax.random.normal(keys[2], (3, 1, 32, 32), dtype=jnp.float32)
    c3 = jax.random.normal(keys[3], (3, 1, 32, 32), dtype=jnp.float32)
    l3 = cycle_consistency(o3, c3, max_tile_rows=8)
    jax.block_until_ready(l3)
    assert jnp.allclose(l3, ref_mae(o3, c3), rtol=1e-5, atol=1e-6), (l3, ref_mae(o3, c3))

    # 3) Even block count -> outer "parallel" axis with per-outer partial sums.
    o4 = jax.random.normal(keys[4], (1, 1, 64, 64), dtype=jnp.float32)
    c4 = jax.random.normal(keys[5], (1, 1, 64, 64), dtype=jnp.float32)
    l4 = cycle_consistency(o4, c4, max_tile_rows=8)
    jax.block_until_ready(l4)
    assert jnp.allclose(l4, ref_mae(o4, c4), rtol=1e-5, atol=1e-6), (l4, ref_mae(o4, c4))

    # 4) Unaligned remainder: 2560 elems -> 16 kernel rows + 4 leftover rows via jnp.
    o5 = jax.random.normal(keys[6], (5, 512), dtype=jnp.float32)
    c5 = jax.random.normal(keys[7], (5, 512), dtype=jnp.float32)
    l5 = cycle_consistency(o5, c5, max_tile_rows=16)
    jax.block_until_ready(l5)
    assert jnp.allclose(l5, ref_mae(o5, c5), rtol=1e-5, atol=1e-6), (l5, ref_mae(o5, c5))

    print("KERNEL_OK")
</pallas_src>

<mosaic_0001>
module attributes {stable_mosaic.version = 11 : i64} {
  func.func @_mae_partial_kernel(%arg0: i32, %arg1: i32, %arg2: memref<16x128xf32, #tpu.memory_space<vmem>>, %arg3: memref<16x128xf32, #tpu.memory_space<vmem>>, %arg4: memref<8x128xf32, #tpu.memory_space<vmem>>) attributes {dimension_semantics = [#tpu.dimension_semantics<parallel>, #tpu.dimension_semantics<arbitrary>], iteration_bounds = array<i64: 1, 1>, scalar_prefetch = 0 : i64, scratch_operands = 0 : i64, tpu.core_type = #tpu.core_type<tc>, window_params = [{transform_indices = @transform_0, window_bounds = array<i64: 16, 128>}, {transform_indices = @transform_1, window_bounds = array<i64: 16, 128>}, {transform_indices = @transform_2, window_bounds = array<i64: 8, 128>}]} {
    %c0_i32 = arith.constant 0 : i32
    %0 = arith.cmpi eq, %arg1, %c0_i32 : i32
    %1 = arith.extui %0 : i1 to i32
    %c0_i32_0 = arith.constant 0 : i32
    %2 = arith.cmpi ne, %1, %c0_i32_0 : i32
    scf.if %2 {
      %cst_10 = arith.constant 0.000000e+00 : f32
      %25 = vector.broadcast %cst_10 : f32 to vector<8x128xf32>
      %c0_11 = arith.constant 0 : index
      %c0_12 = arith.constant 0 : index
      %26 = vector.load %arg4[%c0_11, %c0_12] : memref<8x128xf32, #tpu.memory_space<vmem>>, vector<8x128xf32>
      tpu.vector_store %arg4[%c0_11, %c0_12], %25 {strides = array<i32>} : memref<8x128xf32, #tpu.memory_space<vmem>>, vector<8x128xf32>,
    } else {
    }
    %c0 = arith.constant 0 : index
    %c0_1 = arith.constant 0 : index
    %3 = vector.load %arg4[%c0, %c0_1] : memref<8x128xf32, #tpu.memory_space<vmem>>, vector<8x128xf32>
    %cst = arith.constant 0.000000e+00 : f32
    %4 = vector.broadcast %cst : f32 to vector<8x128xf32>
    %c0_i32_2 = arith.constant 0 : i32
    %c8_i32 = arith.constant 8 : i32
    %5 = arith.muli %c0_i32_2, %c8_i32 : i32
    %6 = tpu.assume_multiple %5, 8 : i32
    %7 = arith.index_cast %6 : i32 to index
    %c0_3 = arith.constant 0 : index
    %8 = vector.load %arg2[%7, %c0_3] : memref<16x128xf32, #tpu.memory_space<vmem>>, vector<8x128xf32>
    %9 = arith.index_cast %6 : i32 to index
    %c0_4 = arith.constant 0 : index
    %10 = vector.load %arg3[%9, %c0_4] : memref<16x128xf32, #tpu.memory_space<vmem>>, vector<8x128xf32>
    %11 = arith.subf %8, %10 : vector<8x128xf32>
    %12 = math.absf %11 : vector<8x128xf32>
    %13 = arith.addf %4, %12 : vector<8x128xf32>
    %c1_i32 = arith.constant 1 : i32
    %c8_i32_5 = arith.constant 8 : i32
    %14 = arith.muli %c1_i32, %c8_i32_5 : i32
    %15 = tpu.assume_multiple %14, 8 : i32
    %16 = arith.index_cast %15 : i32 to index
    %c0_6 = arith.constant 0 : index
    %17 = vector.load %arg2[%16, %c0_6] : memref<16x128xf32, #tpu.memory_space<vmem>>, vector<8x128xf32>
    %18 = arith.index_cast %15 : i32 to index
    %c0_7 = arith.constant 0 : index
    %19 = vector.load %arg3[%18, %c0_7] : memref<16x128xf32, #tpu.memory_space<vmem>>, vector<8x128xf32>
    %20 = arith.subf %17, %19 : vector<8x128xf32>
    %21 = math.absf %20 : vector<8x128xf32>
    %22 = arith.addf %13, %21 : vector<8x128xf32>
    %c2_i32 = arith.constant 2 : i32
    %23 = arith.addf %3, %22 : vector<8x128xf32>
    %c0_8 = arith.constant 0 : index
    %c0_9 = arith.constant 0 : index
    %24 = vector.load %arg4[%c0_8, %c0_9] : memref<8x128xf32, #tpu.memory_space<vmem>>, vector<8x128xf32>
    tpu.vector_store %arg4[%c0_8, %c0_9], %23 {strides = array<i32>} : memref<8x128xf32, #tpu.memory_space<vmem>>, vector<8x128xf32>,
    return
  }
  func.func @transform_0(%arg0: i32, %arg1: i32) -> (i32, i32) {
    %c1_i32 = arith.constant 1 : i32
    %0 = arith.muli %arg0, %c1_i32 : i32
    %1 = arith.addi %0, %arg1 : i32
    %c0_i32 = arith.constant 0 : i32
    %c0_i32_0 = arith.constant 0 : i32
    return %1, %c0_i32 : i32, i32
  }
  func.func @transform_1(%arg0: i32, %arg1: i32) -> (i32, i32) {
    %c1_i32 = arith.constant 1 : i32
    %0 = arith.muli %arg0, %c1_i32 : i32
    %1 = arith.addi %0, %arg1 : i32
    %c0_i32 = arith.constant 0 : i32
    %c0_i32_0 = arith.constant 0 : i32
    return %1, %c0_i32 : i32, i32
  }
  func.func @transform_2(%arg0: i32, %arg1: i32) -> (i32, i32) {
    %c0_i32 = arith.constant 0 : i32
    %c0_i32_0 = arith.constant 0 : i32
    return %arg0, %c0_i32 : i32, i32
  }
}

</mosaic_0001>

<bundles_post_ra>
// kernel: tpu_custom_call.1
= control target key start
LH: loop header
LB: loop body
LE: loop exit
PB: predicated region body
PF: predicated region fallthrough
CT: control target
= control target key end

     0   :  { %7 = vsyncpa [#allocation3], 0  ;;  %s189_s0 = inlined_call_operand.hbm [shape: f32[16,128], index: 0, kind: input, shape index: {}]   ;;  %s190_s1 = inlined_call_operand.hbm [shape: f32[16,128], index: 1, kind: input, shape index: {}]   ;;  %s191_s2 = inlined_call_operand.hbm [shape: f32[8,128], index: 2, kind: output, shape index: {}]  }
   0x1   :  { %8 = vsyncpa [#allocation6], 0 }
   0x2   :  { %9 = vsyncpa [#allocation4], 0  ;;  %s160_s9 = smov [#allocation2]  }
   0x3   :  { %s19_s10 = sshll.u32 %s160_s9, 4  ;;  %s20_s10 = int_to_ptr.vmem [resolvable:$true] %s19_s10 }
   0x4   :  { %s102_s11 = scalar_lea.vmem %s20_s10, 256  ;;  %p107_p1 = scmp.lt.s32.totalorder %s20_s10, %s20_s10 }
   0x5   :  { %p103_p0 = scmp.ne.s32.totalorder %s20_s10, %s102_s11  ;;  %p108_p2 = scmp.lt.s32.totalorder %s102_s11, %s102_s11 }
   0x7   :  { %p109_p3 = por %p108_p2, %p107_p1 }
   0x9   :  { %p110_p4 = pnand %p109_p3, %p103_p0 }
   0xb   :  { %113 = shalt.err (!%p110_p4)
}
   0xc   :  { %s161_s12 = smov 128   ;;  %s162_s13 = smov 8  }
   0xd   :  { %25 = dma.hbm_to_vmem [thread:$0]  %s189_s0, 256, %s20_s10, [#allocation3], %s161_s12, %s161_s12, %s162_s13  }
   0xe   :  { %s163_s16 = smov [#allocation5]  }
   0xf   :  { %s35_s17 = sshll.u32 %s163_s16, 4  ;;  %s36_s17 = int_to_ptr.vmem [resolvable:$true] %s35_s17 }
  0x10   :  { %s122_s18 = scalar_lea.vmem %s36_s17, 256  ;;  %p127_p6 = scmp.lt.s32.totalorder %s36_s17, %s36_s17 }
  0x11   :  { %p123_p5 = scmp.ne.s32.totalorder %s36_s17, %s122_s18  ;;  %p128_p7 = scmp.lt.s32.totalorder %s122_s18, %s122_s18 }
  0x13   :  { %p129_p8 = por %p128_p7, %p127_p6 }
  0x15   :  { %p130_p9 = pnand %p129_p8, %p123_p5 }
  0x17   :  { %133 = shalt.err (!%p130_p9)
}
  0x18   :  { %41 = dma.hbm_to_vmem [thread:$0]  %s190_s1, 256, %s36_s17, [#allocation6], %s161_s12, %s161_s12, %s162_s13  }
  0x19   :  { %154 = dma.done.wait [#allocation3], 256  }
  0x1a   :  { %155 = vsyncadd [#allocation3], 4294967040 }
  0x1b   :  { %156 = dma.done.wait [#allocation6], 256  }
  0x1c   :  { %157 = vsyncadd [#allocation6], 4294967040  ;;  %v58_v0 = vld [vmem:[#allocation2] sm:$0xff]  ;;  %v59_v1 = vld [vmem:[#allocation5] sm:$0xff]  ;;  %s164_s0 = smov [#allocation7]  }
  0x1d   :  { %v64_v2 = vld [vmem:[#allocation2 + $0x8] sm:$0xff]  ;;  %v60_v3 = vsub.f32 %v58_v0, %v59_v1  ;;  %v66_v4 = vld [vmem:[#allocation5 + $0x8] sm:$0xff]  ;;  %s78_s21 = sshll.u32 %s164_s0, 4  ;;  %s79_s21 = int_to_ptr.vmem [resolvable:$true] %s78_s21 }
  0x1e   :  { %v67_v5 = vsub.f32 %v64_v2, %v66_v4  ;;  %s134_s22 = scalar_lea.vmem %s79_s21, 128  ;;  %p139_p11 = scmp.lt.s32.totalorder %s79_s21, %s79_s21 }
  0x1f   :  { %v61_v6 = vand.u32 2147483647, %v60_v3  ;;  %p135_p10 = scmp.ne.s32.totalorder %s79_s21, %s134_s22  ;;  %p140_p12 = scmp.lt.s32.totalorder %s134_s22, %s134_s22 }
  0x20   :  { %v68_v7 = vand.u32 2147483647, %v67_v5 }
  0x21   :  { %p141_p13 = por %p140_p12, %p139_p11 }
  0x22   :  { %v69_v8 = vadd.f32 %v68_v7, %v61_v6 }
  0x23   :  { %p142_p0 = pnand %p141_p13, %p135_p10 }
  0x24   :  { %71 = vst [vmem:[#allocation7] sm:$0xff] %v69_v8 }
  0x25   :  { %145 = shalt.err (!%p142_p0)
}
  0x26   :  { %81 = dma.vmem_to_hbm [thread:$0]  %s79_s21, 128, %s191_s2, [#allocation4]  }
  0x27   :  { %158 = dma.done.wait [#allocation4], 128  }
  0x28   :  { %159 = vsyncadd [#allocation4], 4294967168 }
  0x29   :  { %85 = vsyncpa [#allocation3], 1 }
  0x2a   :  { %86 = vsyncpa [#allocation6], 1 }
  0x2b   :  { %87 = vsyncpa [#allocation4], 1 }

</bundles_post_ra>
